<compile_context>
chip_gen: v6e
topology: v6e:2x2x1
jax: 0.10.0
libtpu: 0.0.40
codegen_flags: <defaults>
</compile_context>

<pallas_src>
import jax
import jax.numpy as jnp
from jax.experimental import pallas as pl
from jax.experimental.pallas import tpu as pltpu


_TARGET_BLOCK_BYTES = 4 * 1024 * 1024   # per-array DMA block (double-buffered by Pallas)
_SMALL_INPUT_BYTES = 2 * 1024 * 1024    # below this a single full-extent block is fine
_CHUNK_ELEMS = 128 * 1024               # in-kernel compute chunk (~0.5 MiB f32 temporaries)
_MIN_GRID_STEPS = 4                     # keep the pipeline (and both v7x TCs) busy


def _sublanes_for(dtype) -> int:
    # f32 -> 8, bf16/f16 -> 16, int8/fp8 -> 32 (packed sublanes travel in groups).
    return {4: 8, 2: 16, 1: 32}.get(jnp.dtype(dtype).itemsize, 8)


def _make_mish_kernel(block_rows: int, lanes: int, chunk_rows: int):
    """Kernel over a (block_rows, lanes) block, computed in row chunks."""
    n_full, rem = divmod(block_rows, chunk_rows)

    def _do_chunk(x_ref, o_ref, r0: int, nrows: int):
        x = x_ref[pl.ds(r0, nrows), :].astype(jnp.float32)
        # Overflow-free single-exp formulation of tanh(softplus(x)):
        #   tanh(log(1+e^x)) = ((1+e^x)^2 - 1) / ((1+e^x)^2 + 1)
        # with u = exp(-|x|) in (0, 1]:
        #   x >= 0:  (2u + 1)   / (2u + 1   + 2u^2)
        #   x <  0:  (u^2 + 2u) / (u^2 + 2u + 2)
        u = jnp.exp(-jnp.abs(x))
        u2 = u * u
        two_u = u + u
        pos = x >= 0.0
        num = jnp.where(pos, two_u + 1.0, u2 + two_u)
        den = num + jnp.where(pos, u2 + u2, 2.0)
        # EUP approx seed + one Newton step on the 4-wide VALU -> ~f32-exact
        # reciprocal without a second EUP issue.
        r = pl.reciprocal(den, approx=True)
        r = r * (2.0 - den * r)
        o_ref[pl.ds(r0, nrows), :] = (x * (num * r)).astype(o_ref.dtype)

    def kernel(x_ref, o_ref):
        for c in range(n_full):
            _do_chunk(x_ref, o_ref, c * chunk_rows, chunk_rows)
        if rem:
            _do_chunk(x_ref, o_ref, n_full * chunk_rows, rem)

    return kernel


def _mish_aligned(x_flat: jax.Array) -> jax.Array:
    """Mish on a 1-D array whose length is a multiple of 128."""
    n = x_flat.shape[0]
    dtype = x_flat.dtype
    itemsize = jnp.dtype(dtype).itemsize
    sub = _sublanes_for(dtype)

    # Widest lane dim (multiple of 128) dividing n -> lane-dense unmasked stores,
    # only a free reshape around the pallas_call.
    lanes = next(c for c in (512, 256, 128) if n % c == 0)
    rows = n // lanes

    # In-kernel compute chunk (rows), rounded to the dtype's sublane packing.
    chunk_rows = max(sub, (_CHUNK_ELEMS // lanes) // sub * sub)

    nbytes = n * itemsize
    if nbytes <= _SMALL_INPUT_BYTES or rows <= chunk_rows:
        block_rows = rows                       # single full-extent block
    else:
        target_rows = max(chunk_rows, (_TARGET_BLOCK_BYTES // itemsize) // lanes)
        min_step_rows = pl.cdiv(rows, _MIN_GRID_STEPS)   # guarantee >= 4 grid steps
        block_rows = min(target_rows, min_step_rows)
        block_rows = max(chunk_rows, (block_rows // chunk_rows) * chunk_rows)

    grid_rows = pl.cdiv(rows, block_rows)
    kernel = _make_mish_kernel(block_rows, lanes, min(chunk_rows, block_rows))
    x2d = x_flat.reshape(rows, lanes)

    out2d = pl.pallas_call(
        kernel,
        out_shape=jax.ShapeDtypeStruct((rows, lanes), dtype),
        grid_spec=pltpu.PrefetchScalarGridSpec(
            num_scalar_prefetch=0,
            grid=(grid_rows,),
            # TODO(synk): if xprof shows exposed DMA at step boundaries, set
            # pipeline_mode=pl.Buffered(3) on the input spec (+1 block of VMEM).
            in_specs=[pl.BlockSpec((block_rows, lanes), lambda i: (i, 0))],
            out_specs=pl.BlockSpec((block_rows, lanes), lambda i: (i, 0)),
        ),
        compiler_params=pltpu.CompilerParams(
            dimension_semantics=("parallel",),
            vmem_limit_bytes=32 * 1024 * 1024,   # needed on v5e (16 MiB scoped default)
        ),
        cost_estimate=pl.CostEstimate(
            flops=11 * n,
            transcendentals=2 * n,               # exp + reciprocal seed
            bytes_accessed=2 * nbytes,
        ),
    )(x2d)
    return out2d.reshape(-1)


def mish(x: jax.Array) -> jax.Array:
    """Mish applied elementwise; x may be any shape (e.g. NCHW)."""
    orig_shape = x.shape
    n = x.size
    if n == 0:
        return x

    x_flat = x.reshape(-1)
    main = (n // 128) * 128

    if main == n:
        return _mish_aligned(x_flat).reshape(orig_shape)

    # Ragged numel: kernel on the 128-aligned prefix, plain jnp on the <128-elem
    # tail. No full-array pad + trailing-slice round trip through HBM.
    parts = []
    if main:
        parts.append(_mish_aligned(x_flat[:main]))
    tail = x_flat[main:].astype(jnp.float32)
    parts.append((tail * jnp.tanh(jax.nn.softplus(tail))).astype(x.dtype))
    out = jnp.concatenate(parts) if len(parts) > 1 else parts[0]
    return out.reshape(orig_shape)


def _mish_ref(x):
    # pure-JAX reference matching torch: x * tanh(softplus(x)), f32 math.
    xf = x.astype(jnp.float32)
    return (xf * jnp.tanh(jax.nn.softplus(xf))).astype(x.dtype)


def _check(x, atol, rtol):
    y = mish(x)
    jax.block_until_ready(y)
    y_ref = _mish_ref(x)
    assert y.shape == x.shape and y.dtype == x.dtype
    ok = jnp.allclose(y.astype(jnp.float32), y_ref.astype(jnp.float32),
                      atol=atol, rtol=rtol)
    assert bool(ok), "mismatch vs reference"


if __name__ == "__main__":
    key = jax.random.PRNGKey(0)
    k0, k1, k2, k3 = jax.random.split(key, 4)

    # Primary: NCHW input, same convention as the PyTorch module's typical usage.
    x = jax.random.normal(k0, (2, 4, 16, 16), dtype=jnp.float32) * 3.0
    _check(x, atol=1e-4, rtol=1e-4)

    # Larger input -> exercises the multi-step grid + chunked in-kernel compute.
    x_big = jax.random.normal(k1, (8, 16, 64, 128), dtype=jnp.float32) * 3.0
    _check(x_big, atol=1e-4, rtol=1e-4)

    # Ragged numel (not a multiple of 128) -> aligned prefix via kernel, jnp tail.
    x_odd = jax.random.normal(k2, (3, 5, 17), dtype=jnp.float32) * 3.0
    _check(x_odd, atol=1e-4, rtol=1e-4)

    # bf16 I/O -> exercises sublane-16 rounding; compute stays f32 in-kernel.
    x_bf16 = (jax.random.normal(k3, (4, 8, 32, 64), dtype=jnp.float32) * 3.0
              ).astype(jnp.bfloat16)
    _check(x_bf16, atol=2e-2, rtol=2e-2)

    print("KERNEL_OK")
</pallas_src>

<mosaic_0001>
module attributes {stable_mosaic.version = 11 : i64} {
  func.func @kernel(%arg0: i32, %arg1: memref<4x512xf32, #tpu.memory_space<vmem>>, %arg2: memref<4x512xf32, #tpu.memory_space<vmem>>) attributes {dimension_semantics = [#tpu.dimension_semantics<parallel>], iteration_bounds = array<i64: 1>, scalar_prefetch = 0 : i64, scratch_operands = 0 : i64, tpu.core_type = #tpu.core_type<tc>, window_params = [{transform_indices = @transform_0, window_bounds = array<i64: 4, 512>}, {transform_indices = @transform_1, window_bounds = array<i64: 4, 512>}]} {
    %c0 = arith.constant 0 : index
    %c0_0 = arith.constant 0 : index
    %0 = vector.load %arg1[%c0, %c0_0] : memref<4x512xf32, #tpu.memory_space<vmem>>, vector<4x512xf32>
    %1 = math.absf %0 : vector<4x512xf32>
    %cst = arith.constant 0.000000e+00 : f32
    %2 = vector.broadcast %cst : f32 to vector<4x512xf32>
    %3 = arith.subf %2, %1 : vector<4x512xf32>
    %4 = math.exp %3 : vector<4x512xf32>
    %5 = arith.mulf %4, %4 : vector<4x512xf32>
    %6 = arith.addf %4, %4 : vector<4x512xf32>
    %cst_1 = arith.constant 0.000000e+00 : f32
    %7 = vector.broadcast %cst_1 : f32 to vector<4x512xf32>
    %8 = arith.cmpf oge, %0, %7 : vector<4x512xf32>
    %cst_2 = arith.constant 1.000000e+00 : f32
    %9 = vector.broadcast %cst_2 : f32 to vector<4x512xf32>
    %10 = arith.addf %6, %9 : vector<4x512xf32>
    %11 = arith.addf %5, %6 : vector<4x512xf32>
    %12 = arith.select %8, %10, %11 : vector<4x512xi1>, vector<4x512xf32>
    %13 = arith.addf %5, %5 : vector<4x512xf32>
    %cst_3 = arith.constant 2.000000e+00 : f32
    %14 = vector.broadcast %cst_3 : f32 to vector<4x512xf32>
    %15 = arith.select %8, %13, %14 : vector<4x512xi1>, vector<4x512xf32>
    %16 = arith.addf %12, %15 : vector<4x512xf32>
    %17 = tpu.reciprocal %16 {approx = true} : vector<4x512xf32> -> vector<4x512xf32>
    %18 = arith.mulf %16, %17 : vector<4x512xf32>
    %cst_4 = arith.constant 2.000000e+00 : f32
    %19 = vector.broadcast %cst_4 : f32 to vector<4x512xf32>
    %20 = arith.subf %19, %18 : vector<4x512xf32>
    %21 = arith.mulf %17, %20 : vector<4x512xf32>
    %22 = arith.mulf %12, %21 : vector<4x512xf32>
    %23 = arith.mulf %0, %22 : vector<4x512xf32>
    %c0_5 = arith.constant 0 : index
    %c0_6 = arith.constant 0 : index
    %24 = vector.load %arg2[%c0_5, %c0_6] : memref<4x512xf32, #tpu.memory_space<vmem>>, vector<4x512xf32>
    tpu.vector_store %arg2[%c0_5, %c0_6], %23 {strides = array<i32>} : memref<4x512xf32, #tpu.memory_space<vmem>>, vector<4x512xf32>,
    return
  }
  func.func @transform_0(%arg0: i32) -> (i32, i32) {
    %c0_i32 = arith.constant 0 : i32
    %c0_i32_0 = arith.constant 0 : i32
    return %arg0, %c0_i32 : i32, i32
  }
  func.func @transform_1(%arg0: i32) -> (i32, i32) {
    %c0_i32 = arith.constant 0 : i32
    %c0_i32_0 = arith.constant 0 : i32
    return %arg0, %c0_i32 : i32, i32
  }
}

</mosaic_0001>

<bundles_post_ra>
// kernel: tpu_custom_call.1
= control target key start
LH: loop header
LB: loop body
LE: loop exit
PB: predicated region body
PF: predicated region fallthrough
CT: control target
= control target key end

     0   :  { %6 = vsyncpa [#allocation3], 0  ;;  %s150_s0 = inlined_call_operand.hbm [shape: f32[4,512], index: 0, kind: input, shape index: {}]   ;;  %s151_s1 = inlined_call_operand.hbm [shape: f32[4,512], index: 1, kind: output, shape index: {}]  }
   0x1   :  { %7 = vsyncpa [#allocation4], 0  ;;  %s132_s6 = smov [#allocation2]  }
   0x2   :  { %s14_s7 = sshll.u32 %s132_s6, 4  ;;  %s15_s7 = int_to_ptr.vmem [resolvable:$true] %s14_s7 }
   0x3   :  { %s96_s8 = scalar_lea.vmem %s15_s7, 256  ;;  %p101_p1 = scmp.lt.s32.totalorder %s15_s7, %s15_s7 }
   0x4   :  { %p97_p0 = scmp.ne.s32.totalorder %s15_s7, %s96_s8  ;;  %p102_p2 = scmp.lt.s32.totalorder %s96_s8, %s96_s8 }
   0x6   :  { %p103_p3 = por %p102_p2, %p101_p1 }
   0x8   :  { %p104_p4 = pnand %p103_p3, %p97_p0 }
   0xa   :  { %107 = shalt.err (!%p104_p4)
}
   0xb   :  { %17 = dma.hbm_to_vmem [thread:$0]  %s150_s0, 256, %s15_s7, [#allocation3]  }
   0xc   :  { %128 = dma.done.wait [#allocation3], 256  }
   0xd   :  { %129 = vsyncadd [#allocation3], 4294967040  ;;  %v21_v0 = vld [vmem:[#allocation2] sm:$0xff]  ;;  %v22_v1 = vld [vmem:[#allocation2 + $0x8] sm:$0xff]  ;;  %s133_s0 = smov [#allocation5]  }
   0xe   :  { %v23_v2 = vand.u32 2147483647, %v21_v0  ;;  %v24_v3 = vand.u32 2147483647, %v22_v1  ;;  %vm35_vm0 = vcmp.ge.f32.partialorder %v21_v0, 0.0  ;;  %vm36_vm1 = vcmp.ge.f32.partialorder %v22_v1, 0.0 }
   0xf   :  { %s69_s11 = sshll.u32 %s133_s0, 4  ;;  %s70_s11 = int_to_ptr.vmem [resolvable:$true] %s69_s11 }
  0x10   :  { %v25_v4 = vsub.f32 0.0, %v23_v2  ;;  %v26_v5 = vsub.f32 0.0, %v24_v3  ;;  %s108_s12 = scalar_lea.vmem %s70_s11, 256  ;;  %p113_p6 = scmp.lt.s32.totalorder %s70_s11, %s70_s11 }
  0x11   :  { %p109_p5 = scmp.ne.s32.totalorder %s70_s11, %s108_s12  ;;  %p114_p7 = scmp.lt.s32.totalorder %s108_s12, %s108_s12 }
  0x12   :  { %v27_v6 = vmul.f32 1.442695, %v25_v4  ;;  %v29_v7 = vmul.f32 1.442695, %v26_v5 }
  0x13   :  { %p115_p8 = por %p114_p7, %p113_p6 }
  0x14   :  { %80 = vpow2.f32 %v27_v6 }
  0x15   :  { %82 = vpow2.f32 %v29_v7  ;;  %p116_p9 = pnand %p115_p8, %p109_p5 }
  0x21   :  { %v81_v8 = vpop.eup %80 }
  0x22   :  { %v83_v9 = vpop.eup %82  ;;  %v31_v10 = vmul.f32 %v81_v8, %v81_v8  ;;  %v33_v11 = vadd.f32 %v81_v8, %v81_v8 }
  0x23   :  { %v32_v12 = vmul.f32 %v83_v9, %v83_v9  ;;  %v34_v13 = vadd.f32 %v83_v9, %v83_v9 }
  0x24   :  { %v37_v14 = vadd.f32 1.0, %v33_v11  ;;  %v39_v15 = vadd.f32 %v33_v11, %v31_v10  ;;  %v43_v16 = vadd.f32 %v31_v10, %v31_v10 }
  0x25   :  { %v38_v17 = vadd.f32 1.0, %v34_v13  ;;  %v40_v18 = vadd.f32 %v34_v13, %v32_v12  ;;  %v44_v19 = vadd.f32 %v32_v12, %v32_v12 }
  0x26   :  { %v41_v20 = vsel %vm35_vm0, %v37_v14, %v39_v15  ;;  %v45_v21 = vsel %vm35_vm0, %v43_v16, 2.0 }
  0x27   :  { %v47_v22 = vadd.f32 %v45_v21, %v41_v20  ;;  %v42_v23 = vsel %vm36_vm1, %v38_v17, %v40_v18  ;;  %v46_v24 = vsel %vm36_vm1, %v44_v19, 2.0 }
  0x28   :  { %v48_v25 = vadd.f32 %v46_v24, %v42_v23 }
  0x29   :  { %84 = vrcp.f32 %v47_v22 }
  0x2a   :  { %86 = vrcp.f32 %v48_v25 }
  0x36   :  { %v85_v26 = vpop.eup %84 }
  0x37   :  { %v87_v27 = vpop.eup %86  ;;  %v51_v28 = vmul.f32 %v85_v26, %v47_v22 }
  0x38   :  { %v52_v29 = vmul.f32 %v87_v27, %v48_v25 }
  0x39   :  { %v53_v30 = vsub.f32 2.0, %v51_v28 }
  0x3a   :  { %v54_v31 = vsub.f32 2.0, %v52_v29 }
  0x3b   :  { %v55_v32 = vmul.f32 %v85_v26, %v53_v30 }
  0x3c   :  { %v56_v33 = vmul.f32 %v87_v27, %v54_v31 }
  0x3d   :  { %v57_v34 = vmul.f32 %v55_v32, %v41_v20 }
  0x3e   :  { %v58_v35 = vmul.f32 %v56_v33, %v42_v23 }
  0x3f   :  { %v59_v36 = vmul.f32 %v57_v34, %v21_v0 }
  0x40   :  { %v60_v37 = vmul.f32 %v58_v35, %v22_v1 }
  0x41   :  { %61 = vst [vmem:[#allocation5] sm:$0xff] %v59_v36 }
  0x42   :  { %62 = vst [vmem:[#allocation5 + $0x8] sm:$0xff] %v60_v37 }
  0x43   :  { %119 = shalt.err (!%p116_p9)
}
  0x44   :  { %72 = dma.vmem_to_hbm [thread:$0]  %s70_s11, 256, %s151_s1, [#allocation4]  }
  0x45   :  { %130 = dma.done.wait [#allocation4], 256  }
  0x46   :  { %131 = vsyncadd [#allocation4], 4294967040 }
  0x47   :  { %76 = vsyncpa [#allocation3], 1 }
  0x48   :  { %77 = vsyncpa [#allocation4], 1 }

</bundles_post_ra>
